<compile_context>
chip_gen: v7x
topology: tpu7x:2x2x1
jax: 0.10.0
libtpu: 0.0.40
codegen_flags: <defaults>
</compile_context>

<pallas_src>
import jax
import jax.numpy as jnp
from jax.experimental import pallas as pl
from jax.experimental.pallas import tpu as pltpu

NEG_SLOPE = 0.1
BN_EPS = 1e-5


def fcnn_kernel(x_ref, w1_ref, b1_ref, w2_ref, b2_ref, w3_ref, b3_ref, o_ref):
    # fc1 + LeakyReLU(0.1): bf16 MXU operands, f32 accumulation / elementwise.
    h = jnp.dot(x_ref[...], w1_ref[...], preferred_element_type=jnp.float32)
    h = h + b1_ref[...]
    h = jnp.maximum(h, NEG_SLOPE * h)

    # dropout(p=0.2): identity in eval/inference mode.
    # TODO(synk): training-mode stochastic dropout not implemented (inference path).
    # BatchNorm1d(running stats) was folded into (w2, b2) in the wrapper.

    # fc2 + LeakyReLU(0.1)
    h = jnp.dot(h.astype(w2_ref.dtype), w2_ref[...],
                preferred_element_type=jnp.float32)
    h = h + b2_ref[...]
    h = jnp.maximum(h, NEG_SLOPE * h)

    # fc3
    h = jnp.dot(h.astype(w3_ref.dtype), w3_ref[...],
                preferred_element_type=jnp.float32)
    h = h + b3_ref[...]

    # LogSoftmax(dim=1), numerically stabilized, f32.
    m = jnp.max(h, axis=1, keepdims=True)
    s = h - m
    lse = jnp.log(jnp.sum(jnp.exp(s), axis=1, keepdims=True))
    # NOTE: output last-dim (nLabels=8) is lane-sparse (masked vst); output bytes
    # are tiny vs streamed x, so we leave it row-major (review option (b)).
    o_ref[...] = (s - lse).astype(o_ref.dtype)


def _fold_batchnorm(params):
    """Fold inference BatchNorm1d (running stats) into fc2's weight/bias."""
    a = params["gamma"] * jax.lax.rsqrt(params["var"] + BN_EPS)          # (1, nH)
    w2f = a.reshape(-1, 1) * params["w2"]                                # (nH, nH)
    b2f = params["b2"] + (params["beta"] - params["mean"] * a) @ params["w2"]
    return w2f, b2f


def fcnn_forward(x, params, *, tile_b=2048, compute_dtype=jnp.bfloat16):
    """x: any shape whose trailing dims flatten to nFeatures; returns (B, nLabels) f32."""
    nFeatures = params["w1"].shape[0]
    nHidden = params["w1"].shape[1]
    nLabels = params["w3"].shape[1]

    x2d = x.reshape(-1, nFeatures)              # == torch x.view(-1, nFeatures)
    B = x2d.shape[0]

    # Batch tile: multiple of 8 sublanes; whole (rounded-up) batch if it is small.
    TB = min(tile_b, ((B + 7) // 8) * 8)
    TB = max(8, (TB // 8) * 8)
    B_pad = pl.cdiv(B, TB) * TB
    if B_pad != B:
        x2d = jnp.pad(x2d, ((0, B_pad - B), (0, 0)))

    # bf16 operands halve HBM traffic for the streamed x (and weights); dots
    # accumulate in f32, all elementwise math stays f32.
    x2d = x2d.astype(compute_dtype)
    w2f, b2f = _fold_batchnorm(params)
    w1 = params["w1"].astype(compute_dtype)
    w2 = w2f.astype(compute_dtype)
    w3 = params["w3"].astype(compute_dtype)
    b1 = params["b1"].astype(jnp.float32)
    b2 = b2f.astype(jnp.float32)
    b3 = params["b3"].astype(jnp.float32)

    grid = (B_pad // TB,)
    full = lambda shape: pl.BlockSpec(shape, lambda i: (0, 0))  # VMEM-resident params

    flops = 2 * B_pad * (nFeatures * nHidden + nHidden * nHidden + nHidden * nLabels)
    bytes_accessed = (x2d.size * x2d.dtype.itemsize          # streamed input
                      + B_pad * nLabels * 4                  # f32 output
                      + (w1.size + w2.size + w3.size) * w1.dtype.itemsize
                      + (b1.size + b2.size + b3.size) * 4)

    out = pl.pallas_call(
        fcnn_kernel,
        out_shape=jax.ShapeDtypeStruct((B_pad, nLabels), jnp.float32),
        grid_spec=pltpu.PrefetchScalarGridSpec(
            num_scalar_prefetch=0,
            grid=grid,
            in_specs=[
                pl.BlockSpec((TB, nFeatures), lambda i: (i, 0)),   # streamed x tile
                full((nFeatures, nHidden)), full((1, nHidden)),    # fc1
                full((nHidden, nHidden)), full((1, nHidden)),      # fc2 (BN folded)
                full((nHidden, nLabels)), full((1, nLabels)),      # fc3
            ],
            out_specs=pl.BlockSpec((TB, nLabels), lambda i: (i, 0)),
        ),
        compiler_params=pltpu.CompilerParams(
            dimension_semantics=("parallel",),   # v7x: shard batch tiles over 2 TCs
        ),
        cost_estimate=pl.CostEstimate(
            flops=flops,
            transcendentals=B_pad * (nLabels + 1),
            bytes_accessed=bytes_accessed,
        ),
    )(x2d, w1, b1, w2, b2, w3, b3)

    return out[:B]


def init_params(key, nFeatures, nHidden, nLabels):
    ks = jax.random.split(key, 6)

    def lin(kw, kb, fan_in, fan_out):
        bound = 1.0 / jnp.sqrt(fan_in)
        w = jax.random.uniform(kw, (fan_in, fan_out), jnp.float32, -bound, bound)
        b = jax.random.uniform(kb, (1, fan_out), jnp.float32, -bound, bound)
        return w, b

    w1, b1 = lin(ks[0], ks[1], nFeatures, nHidden)
    w2, b2 = lin(ks[2], ks[3], nHidden, nHidden)
    w3, b3 = lin(ks[4], ks[5], nHidden, nLabels)
    return {
        "w1": w1, "b1": b1,
        "w2": w2, "b2": b2,
        "w3": w3, "b3": b3,
        # BatchNorm1d defaults (fresh module): gamma=1, beta=0, mean=0, var=1
        "gamma": jnp.ones((1, nHidden), jnp.float32),
        "beta": jnp.zeros((1, nHidden), jnp.float32),
        "mean": jnp.zeros((1, nHidden), jnp.float32),
        "var": jnp.ones((1, nHidden), jnp.float32),
    }


def fcnn_ref_f32(x, p):
    """Pure-f32 reference with explicit (un-folded) BatchNorm, torch op order."""
    nF = p["w1"].shape[0]
    h = x.reshape(-1, nF).astype(jnp.float32)
    h = h @ p["w1"] + p["b1"]
    h = jnp.where(h > 0, h, NEG_SLOPE * h)
    h = (h - p["mean"]) / jnp.sqrt(p["var"] + BN_EPS) * p["gamma"] + p["beta"]
    h = h @ p["w2"] + p["b2"]
    h = jnp.where(h > 0, h, NEG_SLOPE * h)
    h = h @ p["w3"] + p["b3"]
    return jax.nn.log_softmax(h, axis=1)


def fcnn_ref_matched(x, p, compute_dtype=jnp.bfloat16):
    """Reference mirroring the kernel's BN folding + bf16 cast pattern."""
    nF = p["w1"].shape[0]
    w2f, b2f = _fold_batchnorm(p)
    h = x.reshape(-1, nF).astype(compute_dtype)
    h = jnp.dot(h, p["w1"].astype(compute_dtype),
                preferred_element_type=jnp.float32) + p["b1"]
    h = jnp.maximum(h, NEG_SLOPE * h)
    h = jnp.dot(h.astype(compute_dtype), w2f.astype(compute_dtype),
                preferred_element_type=jnp.float32) + b2f.astype(jnp.float32)
    h = jnp.maximum(h, NEG_SLOPE * h)
    h = jnp.dot(h.astype(compute_dtype), p["w3"].astype(compute_dtype),
                preferred_element_type=jnp.float32) + p["b3"]
    m = jnp.max(h, axis=1, keepdims=True)
    return (h - m) - jnp.log(jnp.sum(jnp.exp(h - m), axis=1, keepdims=True))


if __name__ == "__main__":
    nFeatures, nHidden, nLabels = 16, 32, 8

    key = jax.random.PRNGKey(0)
    kx, kp, kx2 = jax.random.split(key, 3)
    params = init_params(kp, nFeatures, nHidden, nLabels)

    # Small batch: (2, 4, 16) -> view(-1, 16) = (8, 16)
    x = jax.random.normal(kx, (2, 4, nFeatures), jnp.float32)
    out = jax.block_until_ready(fcnn_forward(x, params))
    assert out.shape == (8, nLabels)
    assert jnp.allclose(out, fcnn_ref_matched(x, params), atol=1e-3, rtol=1e-3), \
        "mismatch vs matched-precision reference"
    assert jnp.allclose(out, fcnn_ref_f32(x, params), atol=1e-1, rtol=1e-1), \
        "mismatch vs f32 reference (BN folding / semantics)"

    # Exercise a multi-step batch grid + tail padding: B=40 with TB=16 -> grid=(3,)
    x2 = jax.random.normal(kx2, (40, nFeatures), jnp.float32)
    out2 = jax.block_until_ready(fcnn_forward(x2, params, tile_b=16))
    assert out2.shape == (40, nLabels)
    assert jnp.allclose(out2, fcnn_ref_matched(x2, params), atol=1e-3, rtol=1e-3), \
        "mismatch on padded multi-tile batch"

    print("KERNEL_OK")
</pallas_src>

<mosaic_0001>
module attributes {stable_mosaic.version = 11 : i64} {
  func.func @fcnn_kernel(%arg0: i32, %arg1: memref<8x16xbf16, #tpu.memory_space<vmem>>, %arg2: memref<16x32xbf16, #tpu.memory_space<vmem>>, %arg3: memref<1x32xf32, #tpu.memory_space<vmem>>, %arg4: memref<32x32xbf16, #tpu.memory_space<vmem>>, %arg5: memref<1x32xf32, #tpu.memory_space<vmem>>, %arg6: memref<32x8xbf16, #tpu.memory_space<vmem>>, %arg7: memref<1x8xf32, #tpu.memory_space<vmem>>, %arg8: memref<8x8xf32, #tpu.memory_space<vmem>>) attributes {dimension_semantics = [#tpu.dimension_semantics<parallel>], iteration_bounds = array<i64: 1>, scalar_prefetch = 0 : i64, scratch_operands = 0 : i64, tpu.core_type = #tpu.core_type<tc>, window_params = [{transform_indices = @transform_0, window_bounds = array<i64: 8, 16>}, {pipeline_mode = #tpu.pipeline_mode<synchronous>, transform_indices = @transform_1, window_bounds = array<i64: 16, 32>}, {pipeline_mode = #tpu.pipeline_mode<synchronous>, transform_indices = @transform_2, window_bounds = array<i64: 1, 32>}, {pipeline_mode = #tpu.pipeline_mode<synchronous>, transform_indices = @transform_3, window_bounds = array<i64: 32, 32>}, {pipeline_mode = #tpu.pipeline_mode<synchronous>, transform_indices = @transform_4, window_bounds = array<i64: 1, 32>}, {pipeline_mode = #tpu.pipeline_mode<synchronous>, transform_indices = @transform_5, window_bounds = array<i64: 32, 8>}, {pipeline_mode = #tpu.pipeline_mode<synchronous>, transform_indices = @transform_6, window_bounds = array<i64: 1, 8>}, {transform_indices = @transform_7, window_bounds = array<i64: 8, 8>}]} {
    %c0 = arith.constant 0 : index
    %c0_0 = arith.constant 0 : index
    %0 = vector.load %arg1[%c0, %c0_0] : memref<8x16xbf16, #tpu.memory_space<vmem>>, vector<8x16xbf16>
    %c0_1 = arith.constant 0 : index
    %c0_2 = arith.constant 0 : index
    %1 = vector.load %arg2[%c0_1, %c0_2] : memref<16x32xbf16, #tpu.memory_space<vmem>>, vector<16x32xbf16>
    %cst = arith.constant dense<0.000000e+00> : vector<8x32xf32>
    %2 = tpu.matmul %0, %1, %cst {dimension_numbers = #tpu.dot_dimension_numbers<[1], [0], [0], [1], [0, 0, 1, 1], [], []>} : vector<8x16xbf16>, vector<16x32xbf16>, vector<8x32xf32> -> vector<8x32xf32>
    %c0_3 = arith.constant 0 : index
    %c0_4 = arith.constant 0 : index
    %3 = vector.load %arg3[%c0_3, %c0_4] : memref<1x32xf32, #tpu.memory_space<vmem>>, vector<1x32xf32>
    %4 = vector.broadcast %3 : vector<1x32xf32> to vector<8x32xf32>
    %5 = arith.addf %2, %4 : vector<8x32xf32>
    %cst_5 = arith.constant 1.000000e-01 : f32
    %6 = vector.broadcast %cst_5 : f32 to vector<8x32xf32>
    %7 = arith.mulf %6, %5 : vector<8x32xf32>
    %8 = arith.maximumf %5, %7 : vector<8x32xf32>
    %9 = arith.truncf %8 : vector<8x32xf32> to vector<8x32xbf16>
    %c0_6 = arith.constant 0 : index
    %c0_7 = arith.constant 0 : index
    %10 = vector.load %arg4[%c0_6, %c0_7] : memref<32x32xbf16, #tpu.memory_space<vmem>>, vector<32x32xbf16>
    %cst_8 = arith.constant dense<0.000000e+00> : vector<8x32xf32>
    %11 = tpu.matmul %9, %10, %cst_8 {dimension_numbers = #tpu.dot_dimension_numbers<[1], [0], [0], [1], [0, 0, 1, 1], [], []>} : vector<8x32xbf16>, vector<32x32xbf16>, vector<8x32xf32> -> vector<8x32xf32>
    %c0_9 = arith.constant 0 : index
    %c0_10 = arith.constant 0 : index
    %12 = vector.load %arg5[%c0_9, %c0_10] : memref<1x32xf32, #tpu.memory_space<vmem>>, vector<1x32xf32>
    %13 = vector.broadcast %12 : vector<1x32xf32> to vector<8x32xf32>
    %14 = arith.addf %11, %13 : vector<8x32xf32>
    %cst_11 = arith.constant 1.000000e-01 : f32
    %15 = vector.broadcast %cst_11 : f32 to vector<8x32xf32>
    %16 = arith.mulf %15, %14 : vector<8x32xf32>
    %17 = arith.maximumf %14, %16 : vector<8x32xf32>
    %18 = arith.truncf %17 : vector<8x32xf32> to vector<8x32xbf16>
    %c0_12 = arith.constant 0 : index
    %c0_13 = arith.constant 0 : index
    %19 = vector.load %arg6[%c0_12, %c0_13] : memref<32x8xbf16, #tpu.memory_space<vmem>>, vector<32x8xbf16>
    %cst_14 = arith.constant dense<0.000000e+00> : vector<8x8xf32>
    %20 = tpu.matmul %18, %19, %cst_14 {dimension_numbers = #tpu.dot_dimension_numbers<[1], [0], [0], [1], [0, 0, 1, 1], [], []>} : vector<8x32xbf16>, vector<32x8xbf16>, vector<8x8xf32> -> vector<8x8xf32>
    %c0_15 = arith.constant 0 : index
    %c0_16 = arith.constant 0 : index
    %21 = vector.load %arg7[%c0_15, %c0_16] : memref<1x8xf32, #tpu.memory_space<vmem>>, vector<1x8xf32>
    %22 = vector.broadcast %21 : vector<1x8xf32> to vector<8x8xf32>
    %23 = arith.addf %20, %22 : vector<8x8xf32>
    %cst_17 = arith.constant dense<0xFF800000> : vector<8xf32>
    %24 = vector.multi_reduction <maximumf>, %23, %cst_17 [1] : vector<8x8xf32> to vector<8xf32>
    %25 = vector.shape_cast %24 : vector<8xf32> to vector<8x1xf32>
    %26 = vector.broadcast %25 : vector<8x1xf32> to vector<8x8xf32>
    %27 = arith.subf %23, %26 : vector<8x8xf32>
    %28 = math.exp %27 : vector<8x8xf32>
    %cst_18 = arith.constant dense<0.000000e+00> : vector<8xf32>
    %29 = vector.multi_reduction <add>, %28, %cst_18 [1] : vector<8x8xf32> to vector<8xf32>
    %30 = vector.shape_cast %29 : vector<8xf32> to vector<8x1xf32>
    %31 = math.log %30 : vector<8x1xf32>
    %32 = vector.broadcast %31 : vector<8x1xf32> to vector<8x8xf32>
    %33 = arith.subf %27, %32 : vector<8x8xf32>
    %c0_19 = arith.constant 0 : index
    %c0_20 = arith.constant 0 : index
    %34 = vector.load %arg8[%c0_19, %c0_20] : memref<8x8xf32, #tpu.memory_space<vmem>>, vector<8x8xf32>
    tpu.vector_store %arg8[%c0_19, %c0_20], %33 {strides = array<i32>} : memref<8x8xf32, #tpu.memory_space<vmem>>, vector<8x8xf32>,
    return
  }
  func.func @transform_0(%arg0: i32) -> (i32, i32) {
    %c0_i32 = arith.constant 0 : i32
    %c0_i32_0 = arith.constant 0 : i32
    return %arg0, %c0_i32 : i32, i32
  }
  func.func @transform_1(%arg0: i32) -> (i32, i32) {
    %c0_i32 = arith.constant 0 : i32
    %c0_i32_0 = arith.constant 0 : i32
    %c0_i32_1 = arith.constant 0 : i32
    return %c0_i32, %c0_i32_0 : i32, i32
  }
  func.func @transform_2(%arg0: i32) -> (i32, i32) {
    %c0_i32 = arith.constant 0 : i32
    %c0_i32_0 = arith.constant 0 : i32
    %c0_i32_1 = arith.constant 0 : i32
    return %c0_i32, %c0_i32_0 : i32, i32
  }
  func.func @transform_3(%arg0: i32) -> (i32, i32) {
    %c0_i32 = arith.constant 0 : i32
    %c0_i32_0 = arith.constant 0 : i32
    %c0_i32_1 = arith.constant 0 : i32
    return %c0_i32, %c0_i32_0 : i32, i32
  }
  func.func @transform_4(%arg0: i32) -> (i32, i32) {
    %c0_i32 = arith.constant 0 : i32
    %c0_i32_0 = arith.constant 0 : i32
    %c0_i32_1 = arith.constant 0 : i32
    return %c0_i32, %c0_i32_0 : i32, i32
  }
  func.func @transform_5(%arg0: i32) -> (i32, i32) {
    %c0_i32 = arith.constant 0 : i32
    %c0_i32_0 = arith.constant 0 : i32
    %c0_i32_1 = arith.constant 0 : i32
    return %c0_i32, %c0_i32_0 : i32, i32
  }
  func.func @transform_6(%arg0: i32) -> (i32, i32) {
    %c0_i32 = arith.constant 0 : i32
    %c0_i32_0 = arith.constant 0 : i32
    %c0_i32_1 = arith.constant 0 : i32
    return %c0_i32, %c0_i32_0 : i32, i32
  }
  func.func @transform_7(%arg0: i32) -> (i32, i32) {
    %c0_i32 = arith.constant 0 : i32
    %c0_i32_0 = arith.constant 0 : i32
    return %arg0, %c0_i32 : i32, i32
  }
}

</mosaic_0001>

<bundles_post_ra>
// kernel: tpu_custom_call.1
= control target key start
LH: loop header
LB: loop body
LE: loop exit
PB: predicated region body
PF: predicated region fallthrough
CT: control target
= control target key end

     0   :  { %v332_v1 = vmov 0.0   ;;  %vm44_vm0 = vcmask 130048   ;;  %vm333_vm1 = vmmov 0   ;;  %s419_s0 = inlined_call_operand.vmem [shape: bf16[8,16], index: 0, kind: input, shape index: {}]   ;;  %s420_s1 = inlined_call_operand.vmem [shape: bf16[16,32], index: 1, kind: input, shape index: {}]   ;;  %s421_s2 = inlined_call_operand.vmem [shape: f32[1,32], index: 2, kind: input, shape index: {}]   ;;  %s422_s3 = inlined_call_operand.vmem [shape: bf16[32,32], index: 3, kind: input, shape index: {}]   ;;  %s423_s4 = inlined_call_operand.vmem [shape: f32[1,32], index: 4, kind: input, shape index: {}]   ;;  %s424_s5 = inlined_call_operand.vmem [shape: bf16[32,8], index: 5, kind: input, shape index: {}]   ;;  %s425_s6 = inlined_call_operand.vmem [shape: f32[1,8], index: 6, kind: input, shape index: {}]   ;;  %s426_s7 = inlined_call_operand.hbm [shape: f32[8,8], index: 7, kind: output, shape index: {}]  }
   0x1   :  { %v299_v0 = vld [vmem:[%s420_s1] sm:$0xff]   ;;  %274 = vmatprep.subr.bf16.mxu0 %v332_v1  ;;  %280 = vmatprep.subr.bf16.mxu1 %v332_v1 }
   0x2   :  { %v28_v2 = vld [vmem:[%s419_s0] sm:$0xf]  ;;  %275 = vmatpush3.bf16.msra.mxu0 %v299_v0  ;;  %276 = vmatprep.mubr.msk.bf16.mxu0 %vm333_vm1, %v332_v1 }
   0x3   :  { %284 = vmatprep.mubr.msk.bf16.mxu1 %vm333_vm1, %v332_v1  ;;  %288 = vmatprep.subr.bf16.mxu0 %v332_v1 }
   0x4   :  { %12 = vsyncpa [#allocation3], 0  ;;  %v300_v3 = vld [vmem:[%s422_s3] sm:$0xff]   ;;  %v301_v4 = vld [vmem:[%s422_s3 + $0x8] sm:$0xff]   ;;  %vm114_vm2 = vcmask 261120   ;;  %vm227_vm3 = vcmask 64512  }
   0x5   :  { %277 = vmatmul.mubr.msk.bf16.vlgmr.msra.gmra.mrb[0].mxu0 %vm44_vm0, %v28_v2  ;;  %281 = vmatpush3.bf16.msra.mxu1 %v300_v3  ;;  %v255_v5 = vld [vmem:[%s421_s2] ss:$0 sm:$0xff]  ;;  %v303_v15 = vld [vmem:[%s424_s5 + $0x8] sm:$0xff]  }
   0x6   :  { %292 = vmatprep.mubr.msk.bf16.mxu0 %vm333_vm1, %v332_v1  ;;  %282 = vmatprep.subr.bf16.mxu1 %v332_v1  ;;  %v302_v14 = vld [vmem:[%s424_s5] sm:$0xff]  }
   0x7   :  { %289 = vmatpush3.bf16.msra.mxu0 %v302_v14  ;;  %v258_v16 = vld [vmem:[%s423_s4] ss:$0 sm:$0xff]  ;;  %s334_s4 = smov [#allocation2]  }
   0x8   :  { %290 = vmatprep.subr.bf16.mxu0 %v332_v1  ;;  %v262_v25 = vld [vmem:[%s425_s6] ss:$0 sm:$0xff]  ;;  %s247_s5 = sshll.u32 %s334_s4, 4  ;;  %s248_s5 = int_to_ptr.vmem [resolvable:$true] %s247_s5 }
   0x9   :  { %283 = vmatpush3.bf16.msra.mxu1 %v301_v4  ;;  %s308_s6 = scalar_lea.vmem %s248_s5, 128  ;;  %p313_p1 = scmp.lt.s32.totalorder %s248_s5, %s248_s5 }
   0xa   :  { %p309_p0 = scmp.ne.s32.totalorder %s248_s5, %s308_s6  ;;  %p314_p2 = scmp.lt.s32.totalorder %s308_s6, %s308_s6 }
   0xb   :  { %291 = vmatpush3.bf16.msra.mxu0 %v303_v15 }
   0xc   :  { %p315_p3 = por %p314_p2, %p313_p1 }
   0xe   :  { %p316_p4 = pnand %p315_p3, %p309_p0 }
  0xd8   :  { %v82_v6 = vpop.f32.mrb[0].mxu0 }
  0xd9   :  { %v83_v7 = vadd.f32 %v255_v5, %v82_v6  ;;  %v278_v8 = vpop.f32.mrb[1].mxu0 }
  0xda   :  { %v85_v9 = vpop.f32.mrb[2].mxu0 }
  0xdb   :  { %v88_v10 = vmul.f32 0.1, %v83_v7  ;;  %v279_v11 = vpop.f32.mrb[3].mxu0 }
  0xdd   :  { %v89_v12 = vmax.f32 %v83_v7, %v88_v10 }
  0xdf   :  { %v90_v13 = vpack.c.bf16 %v89_v12, %v89_v12 }
  0xe1   :  { %285 = vmatmul.mubr.msk.bf16.vlgmr.msra.gmra.mrb[0].mxu1 %vm114_vm2, %v90_v13 }
 0x1b4   :  { %v152_v17 = vpop.f32.mrb[0].mxu1 }
 0x1b5   :  { %v153_v18 = vadd.f32 %v258_v16, %v152_v17  ;;  %v286_v19 = vpop.f32.mrb[1].mxu1 }
 0x1b6   :  { %v155_v20 = vpop.f32.mrb[2].mxu1 }
 0x1b7   :  { %v158_v21 = vmul.f32 0.1, %v153_v18  ;;  %v287_v22 = vpop.f32.mrb[3].mxu1 }
 0x1b9   :  { %v159_v23 = vmax.f32 %v153_v18, %v158_v21 }
 0x1bb   :  { %v160_v24 = vpack.c.bf16 %v159_v23, %v159_v23 }
 0x1bd   :  { %293 = vmatmul.mubr.msk.bf16.vlgmr.msra.gmra.mrb[4].mxu0 %vm114_vm2, %v160_v24 }
 0x290   :  { %v221_v26 = vpop.f32.mrb[4].mxu0 }
 0x291   :  { %v222_v27 = vadd.f32 %v262_v25, %v221_v26  ;;  %v294_v28 = vpop.f32.mrb[5].mxu0 }
 0x292   :  { %v224_v29 = vpop.f32.mrb[6].mxu0 }
 0x293   :  { %v295_v30 = vpop.f32.mrb[7].mxu0  ;;  %v228_v31 = vsel %vm227_vm3, %v222_v27, -inf }
 0x294   :  { %229 = vmax.xlane.f32.xlu0 %v228_v31 }
 0x321   :  { %v230_v32 = vpop.xlane.xlu0 %229 }
 0x322   :  { %v231_v33 = vsub.f32 %v222_v27, %v230_v32 }
 0x324   :  { %v232_v34 = vmul.f32 1.442695, %v231_v33 }
 0x326   :  { %304 = vpow2.f32 %v232_v34 }
 0x330   :  { %v305_v35 = vpop.eup %304 }
 0x331   :  { %v234_v36 = vsel %vm227_vm3, %v305_v35, 0.0 }
 0x332   :  { %235 = vadd.xlane.f32.xlu0 %v234_v36 }
 0x3bf   :  { %v236_v37 = vpop.xlane.xlu0 %235 }
 0x3c0   :  { %306 = vlog2.f32 %v236_v37 }
 0x3ca   :  { %v307_v38 = vpop.eup %306 }
 0x3cb   :  { %v238_v39 = vmul.f32 0.6931472, %v307_v38 }
 0x3cd   :  { %v239_v40 = vsub.f32 %v231_v33, %v238_v39 }
 0x3cf   :  { %240 = vst.msk [vmem:[#allocation2] sm:$0xff] %vm227_vm3, %v239_v40 }
 0x3d0   :  { %319 = shalt.err (!%p316_p4)
}
 0x3d1   :  { %s320_s17 = scalar_lea.hbm %s426_s7, 128 }
 0x3d2   :  { %p321_p5 = scmp.ne.s32.totalorder %s426_s7, %s320_s17  ;;  %p324_p6 = scmp.lt.u32.totalorder %s320_s17, %s426_s7 }
 0x3d4   :  { %p326_p7 = pnand %p324_p6, %p321_p5 }
 0x3d6   :  { %329 = shalt.err (!%p326_p7)
}
 0x3d7   :  { %250 = dma.vmem_to_hbm [thread:$0]  %s248_s5, 128, %s426_s7, [#allocation3]  }
 0x3d8   :  { %330 = dma.done.wait [#allocation3], 128  }
 0x3d9   :  { %331 = vsyncadd [#allocation3], 4294967168 }
 0x3da   :  { %254 = vsyncpa [#allocation3], 1 }

</bundles_post_ra>
